<compile_context>
chip_gen: v5e
topology: v5e:2x2
jax: 0.10.0
libtpu: 0.0.40
codegen_flags: <defaults>
</compile_context>

<pallas_src>
import jax
import jax.numpy as jnp
from jax import lax
from jax.experimental import pallas as pl
from jax.experimental.pallas import tpu as pltpu


def _make_minkloc_kernel(n_true, n_pad, gem_p, gem_eps, norm_eps,
                         normalize_embeddings):
    inv_p = 1.0 / gem_p
    inv_n = 1.0 / n_true
    p_int = int(gem_p) if (float(gem_p).is_integer() and gem_p > 0) else None

    def _pow_p(v):
        # Integer GeM power -> VPU multiply chain; fallback to float pow.
        if p_int is not None:
            return lax.integer_pow(v, p_int)
        return jnp.power(v, gem_p)

    def kernel(x_ref, w_ref, b_ref, o_ref, acc_ref):
        ni = pl.program_id(1)

        @pl.when(ni == 0)
        def _init():
            acc_ref[...] = jnp.zeros_like(acc_ref)

        tb, tn, c_in = x_ref.shape
        c_feat = o_ref.shape[-1]

        # ---- "backbone": per-point linear + ReLU, batched over TB samples.
        # (TB, TN, C_in) -> (TB*TN, C_in): one large-M bf16 MXU matmul/step.
        x = x_ref[...].reshape(tb * tn, c_in).astype(jnp.bfloat16)
        feat = jnp.dot(x, w_ref[...], preferred_element_type=jnp.float32)

        # ---- GeM: ReLU fused into the clamp (eps > 0).
        clamped = jnp.maximum(feat + b_ref[...], gem_eps)   # (TB*TN, C_feat)
        powered = _pow_p(clamped).reshape(tb, tn, c_feat)

        acc_ref[...] += jnp.sum(powered, axis=1)             # (TB, C_feat) f32

        @pl.when(ni == pl.num_programs(1) - 1)
        def _finalize():
            acc = acc_ref[...]
            if n_pad > 0:
                # Zero-padded tail point rows contribute exactly
                # max(0 @ W + b, eps)^p = max(b, eps)^p each; subtract their
                # closed-form sum instead of masking every hot-loop tile.
                pad_term = jnp.float32(n_pad) * _pow_p(
                    jnp.maximum(b_ref[...], gem_eps))
                acc = jnp.maximum(acc - pad_term, gem_eps ** gem_p)
            pooled = acc * jnp.float32(inv_n)                # mean over points
            pooled = jnp.power(pooled, inv_p)                # only (TB, C_feat)
            if normalize_embeddings:                         # F.normalize(p=2, dim=1)
                sq = jnp.sum(pooled * pooled, axis=1, keepdims=True)
                pooled = pooled * lax.rsqrt(
                    jnp.maximum(sq, norm_eps * norm_eps))
            o_ref[...] = pooled.astype(o_ref.dtype)

    return kernel


def minkloc_forward(x, w, b, *, gem_p=3.0, gem_eps=1e-6, norm_eps=1e-12,
                    normalize_embeddings=True, tile_b=8, tile_n=512):
    """MinkLoc forward.

    x: (B, N, C_in) f32 dense surrogate of the sparse point features
       (B batch elements, N points each, channels-last).
    w: (C_in, C_feat), b: (1, C_feat) "backbone" linear parameters.
    Returns (B, C_feat) global descriptors.
    """
    B, N, C_in = x.shape
    assert w.shape[0] == C_in, (w.shape, C_in)
    C_feat = w.shape[-1]

    tb = min(tile_b, B)
    tn = min(tile_n, N)
    tn = ((tn + 7) // 8) * 8          # keep the point tile sublane-aligned
    Bp = pl.cdiv(B, tb) * tb
    Np = pl.cdiv(N, tn) * tn
    if Bp != B or Np != N:
        x = jnp.pad(x, ((0, Bp - B), (0, Np - N), (0, 0)))

    # bf16 MXU inputs (f32 accumulate). The weight is tiny and stays resident.
    w_bf16 = w.astype(jnp.bfloat16)
    b_f32 = b.reshape(1, C_feat).astype(jnp.float32)

    kernel = _make_minkloc_kernel(
        n_true=N, n_pad=Np - N, gem_p=gem_p, gem_eps=gem_eps,
        norm_eps=norm_eps, normalize_embeddings=normalize_embeddings)

    # batch-blocks (parallel, megacore-shardable), N-tiles (reduction, last).
    grid = (Bp // tb, Np // tn)

    out = pl.pallas_call(
        kernel,
        out_shape=jax.ShapeDtypeStruct((Bp, C_feat), x.dtype),
        grid_spec=pltpu.PrefetchScalarGridSpec(
            num_scalar_prefetch=0,
            grid=grid,
            in_specs=[
                pl.BlockSpec((tb, tn, C_in), lambda bi, ni: (bi, ni, 0)),
                pl.BlockSpec((C_in, C_feat), lambda bi, ni: (0, 0)),
                pl.BlockSpec((1, C_feat), lambda bi, ni: (0, 0)),
            ],
            out_specs=pl.BlockSpec((tb, C_feat), lambda bi, ni: (bi, 0)),
            scratch_shapes=[pltpu.VMEM((tb, C_feat), jnp.float32)],
        ),
        compiler_params=pltpu.CompilerParams(
            dimension_semantics=("parallel", "arbitrary")),
        cost_estimate=pl.CostEstimate(
            flops=2 * Bp * Np * C_in * C_feat + 6 * Bp * Np * C_feat,
            transcendentals=2 * Bp * C_feat,
            bytes_accessed=(Bp * Np * C_in * 4 + C_in * C_feat * 2
                            + C_feat * 4 + Bp * C_feat * 4),
        ),
    )(x, w_bf16, b_f32)

    return out[:B]


def minkloc_reference(x, w, b, *, gem_p=3.0, gem_eps=1e-6, norm_eps=1e-12,
                      normalize_embeddings=True):
    # Pure-JAX reference with the same dtype policy (bf16 MXU in, f32 math).
    feat = jnp.einsum("bnc,cf->bnf", x.astype(jnp.bfloat16),
                      w.astype(jnp.bfloat16),
                      preferred_element_type=jnp.float32)
    feat = jnp.maximum(feat + b.reshape(1, 1, -1), 0.0)            # ReLU
    pooled = jnp.mean(jnp.maximum(feat, gem_eps) ** gem_p, axis=1)
    pooled = pooled ** (1.0 / gem_p)                               # GeM
    if normalize_embeddings:
        n = jnp.sqrt(jnp.sum(pooled * pooled, axis=1, keepdims=True))
        pooled = pooled / jnp.maximum(n, norm_eps)
    return pooled


if __name__ == "__main__":
    # Small shapes consistent with the module's forward contract:
    #   B=2 batch elements, N=40 points each (not a multiple of the point
    #   tile -> exercises the padded-tail correction + accumulator), C_in=4
    #   input feature channels, C_feat=32 = pooling in_dim / output_dim.
    B, N, C_in, C_feat = 2, 40, 4, 32

    key = jax.random.PRNGKey(0)
    kx, kw, kb = jax.random.split(key, 3)
    x = jax.random.normal(kx, (B, N, C_in), dtype=jnp.float32)
    # Deterministic synthetic "backbone" parameters (not a checkpoint).
    w = jax.random.normal(kw, (C_in, C_feat), dtype=jnp.float32) * 0.1
    b = jax.random.normal(kb, (1, C_feat), dtype=jnp.float32) * 0.01

    out = minkloc_forward(x, w, b, gem_p=3.0, gem_eps=1e-6,
                          normalize_embeddings=True, tile_b=8, tile_n=16)
    out = jax.block_until_ready(out)

    ref = minkloc_reference(x, w, b, gem_p=3.0, gem_eps=1e-6,
                            normalize_embeddings=True)
    assert out.shape == (B, C_feat), out.shape
    max_err = float(jnp.max(jnp.abs(out - ref)))
    assert jnp.allclose(out, ref, atol=1e-4, rtol=1e-4), max_err

    print("KERNEL_OK")
</pallas_src>

<mosaic_0001>
module attributes {stable_mosaic.version = 11 : i64} {
  func.func @kernel(%arg0: i32, %arg1: i32, %arg2: memref<2x16x4xf32, #tpu.memory_space<vmem>>, %arg3: memref<4x32xbf16, #tpu.memory_space<vmem>>, %arg4: memref<1x32xf32, #tpu.memory_space<vmem>>, %arg5: memref<2x32xf32, #tpu.memory_space<vmem>>, %arg6: memref<2x32xf32, #tpu.memory_space<vmem>>) attributes {dimension_semantics = [#tpu.dimension_semantics<parallel>, #tpu.dimension_semantics<arbitrary>], iteration_bounds = array<i64: 1, 3>, scalar_prefetch = 0 : i64, scratch_operands = 1 : i64, tpu.core_type = #tpu.core_type<tc>, window_params = [{transform_indices = @transform_0, window_bounds = array<i64: 2, 16, 4>}, {pipeline_mode = #tpu.pipeline_mode<synchronous>, transform_indices = @transform_1, window_bounds = array<i64: 4, 32>}, {pipeline_mode = #tpu.pipeline_mode<synchronous>, transform_indices = @transform_2, window_bounds = array<i64: 1, 32>}, {transform_indices = @transform_3, window_bounds = array<i64: 2, 32>}]} {
    %c0_i32 = arith.constant 0 : i32
    %0 = arith.cmpi eq, %arg1, %c0_i32 : i32
    %1 = arith.extui %0 : i1 to i32
    %c0_i32_0 = arith.constant 0 : i32
    %2 = arith.cmpi ne, %1, %c0_i32_0 : i32
    scf.if %2 {
      %cst_14 = arith.constant 0.000000e+00 : f32
      %23 = vector.broadcast %cst_14 : f32 to vector<2x32xf32>
      %c0_15 = arith.constant 0 : index
      %c0_16 = arith.constant 0 : index
      %24 = vector.load %arg6[%c0_15, %c0_16] : memref<2x32xf32, #tpu.memory_space<vmem>>, vector<2x32xf32>
      tpu.vector_store %arg6[%c0_15, %c0_16], %23 {strides = array<i32>} : memref<2x32xf32, #tpu.memory_space<vmem>>, vector<2x32xf32>,
    } else {
    }
    %c0 = arith.constant 0 : index
    %c0_1 = arith.constant 0 : index
    %c0_2 = arith.constant 0 : index
    %3 = vector.load %arg2[%c0, %c0_1, %c0_2] : memref<2x16x4xf32, #tpu.memory_space<vmem>>, vector<2x16x4xf32>
    %4 = vector.shape_cast %3 : vector<2x16x4xf32> to vector<32x4xf32>
    %5 = arith.truncf %4 : vector<32x4xf32> to vector<32x4xbf16>
    %c0_3 = arith.constant 0 : index
    %c0_4 = arith.constant 0 : index
    %6 = vector.load %arg3[%c0_3, %c0_4] : memref<4x32xbf16, #tpu.memory_space<vmem>>, vector<4x32xbf16>
    %cst = arith.constant dense<0.000000e+00> : vector<32x32xf32>
    %7 = tpu.matmul %5, %6, %cst {dimension_numbers = #tpu.dot_dimension_numbers<[1], [0], [0], [1], [0, 0, 1, 1], [], []>} : vector<32x4xbf16>, vector<4x32xbf16>, vector<32x32xf32> -> vector<32x32xf32>
    %c0_5 = arith.constant 0 : index
    %c0_6 = arith.constant 0 : index
    %8 = vector.load %arg4[%c0_5, %c0_6] : memref<1x32xf32, #tpu.memory_space<vmem>>, vector<1x32xf32>
    %9 = vector.broadcast %8 : vector<1x32xf32> to vector<32x32xf32>
    %10 = arith.addf %7, %9 : vector<32x32xf32>
    %cst_7 = arith.constant 9.99999997E-7 : f32
    %11 = vector.broadcast %cst_7 : f32 to vector<32x32xf32>
    %12 = arith.maximumf %10, %11 : vector<32x32xf32>
    %13 = arith.mulf %12, %12 : vector<32x32xf32>
    %14 = arith.mulf %12, %13 : vector<32x32xf32>
    %15 = vector.shape_cast %14 : vector<32x32xf32> to vector<2x16x32xf32>
    %c0_8 = arith.constant 0 : index
    %c0_9 = arith.constant 0 : index
    %16 = vector.load %arg6[%c0_8, %c0_9] : memref<2x32xf32, #tpu.memory_space<vmem>>, vector<2x32xf32>
    %cst_10 = arith.constant dense<0.000000e+00> : vector<2x32xf32>
    %17 = vector.multi_reduction <add>, %15, %cst_10 [1] : vector<2x16x32xf32> to vector<2x32xf32>
    %18 = arith.addf %16, %17 : vector<2x32xf32>
    %c0_11 = arith.constant 0 : index
    %c0_12 = arith.constant 0 : index
    %19 = vector.load %arg6[%c0_11, %c0_12] : memref<2x32xf32, #tpu.memory_space<vmem>>, vector<2x32xf32>
    tpu.vector_store %arg6[%c0_11, %c0_12], %18 {strides = array<i32>} : memref<2x32xf32, #tpu.memory_space<vmem>>, vector<2x32xf32>,
    %c2_i32 = arith.constant 2 : i32
    %20 = arith.cmpi eq, %arg1, %c2_i32 : i32
    %21 = arith.extui %20 : i1 to i32
    %c0_i32_13 = arith.constant 0 : i32
    %22 = arith.cmpi ne, %21, %c0_i32_13 : i32
    scf.if %22 {
      %c0_14 = arith.constant 0 : index
      %c0_15 = arith.constant 0 : index
      %23 = vector.load %arg6[%c0_14, %c0_15] : memref<2x32xf32, #tpu.memory_space<vmem>>, vector<2x32xf32>
      %c0_16 = arith.constant 0 : index
      %c0_17 = arith.constant 0 : index
      %24 = vector.load %arg4[%c0_16, %c0_17] : memref<1x32xf32, #tpu.memory_space<vmem>>, vector<1x32xf32>
      %cst_18 = arith.constant 9.99999997E-7 : f32
      %25 = vector.broadcast %cst_18 : f32 to vector<1x32xf32>
      %26 = arith.maximumf %24, %25 : vector<1x32xf32>
      %27 = arith.mulf %26, %26 : vector<1x32xf32>
      %28 = arith.mulf %26, %27 : vector<1x32xf32>
      %cst_19 = arith.constant 8.000000e+00 : f32
      %29 = vector.broadcast %cst_19 : f32 to vector<1x32xf32>
      %30 = arith.mulf %29, %28 : vector<1x32xf32>
      %31 = vector.broadcast %30 : vector<1x32xf32> to vector<2x32xf32>
      %32 = arith.subf %23, %31 : vector<2x32xf32>
      %cst_20 = arith.constant 1.000000e-18 : f32
      %33 = vector.broadcast %cst_20 : f32 to vector<2x32xf32>
      %34 = arith.maximumf %32, %33 : vector<2x32xf32>
      %cst_21 = arith.constant 2.500000e-02 : f32
      %35 = vector.broadcast %cst_21 : f32 to vector<2x32xf32>
      %36 = arith.mulf %34, %35 : vector<2x32xf32>
      %cst_22 = arith.constant 0.333333343 : f32
      %37 = vector.broadcast %cst_22 : f32 to vector<2x32xf32>
      %38 = math.powf %36, %37 : vector<2x32xf32>
      %39 = arith.mulf %38, %38 : vector<2x32xf32>
      %cst_23 = arith.constant dense<0.000000e+00> : vector<2xf32>
      %40 = vector.multi_reduction <add>, %39, %cst_23 [1] : vector<2x32xf32> to vector<2xf32>
      %41 = vector.shape_cast %40 : vector<2xf32> to vector<2x1xf32>
      %cst_24 = arith.constant 1.000000e-24 : f32
      %42 = vector.broadcast %cst_24 : f32 to vector<2x1xf32>
      %43 = arith.maximumf %41, %42 : vector<2x1xf32>
      %44 = math.rsqrt %43 : vector<2x1xf32>
      %45 = vector.broadcast %44 : vector<2x1xf32> to vector<2x32xf32>
      %46 = arith.mulf %38, %45 : vector<2x32xf32>
      %c0_25 = arith.constant 0 : index
      %c0_26 = arith.constant 0 : index
      %47 = vector.load %arg5[%c0_25, %c0_26] : memref<2x32xf32, #tpu.memory_space<vmem>>, vector<2x32xf32>
      tpu.vector_store %arg5[%c0_25, %c0_26], %46 {strides = array<i32>} : memref<2x32xf32, #tpu.memory_space<vmem>>, vector<2x32xf32>,
    } else {
    }
    return
  }
  func.func @transform_0(%arg0: i32, %arg1: i32) -> (i32, i32, i32) {
    %c0_i32 = arith.constant 0 : i32
    %c0_i32_0 = arith.constant 0 : i32
    return %arg0, %arg1, %c0_i32 : i32, i32, i32
  }
  func.func @transform_1(%arg0: i32, %arg1: i32) -> (i32, i32) {
    %c0_i32 = arith.constant 0 : i32
    %c0_i32_0 = arith.constant 0 : i32
    %c0_i32_1 = arith.constant 0 : i32
    return %c0_i32, %c0_i32_0 : i32, i32
  }
  func.func @transform_2(%arg0: i32, %arg1: i32) -> (i32, i32) {
    %c0_i32 = arith.constant 0 : i32
    %c0_i32_0 = arith.constant 0 : i32
    %c0_i32_1 = arith.constant 0 : i32
    return %c0_i32, %c0_i32_0 : i32, i32
  }
  func.func @transform_3(%arg0: i32, %arg1: i32) -> (i32, i32) {
    %c0_i32 = arith.constant 0 : i32
    %c0_i32_0 = arith.constant 0 : i32
    return %arg0, %c0_i32 : i32, i32
  }
}

</mosaic_0001>

<bundles_post_ra>
// kernel: tpu_custom_call.1
= control target key start
LH: loop header
LB: loop body
LE: loop exit
PB: predicated region body
PF: predicated region fallthrough
CT: control target
= control target key end

     0   :  { %8 = vsyncpa [#allocation5], 0  ;;  %s612_s12 = smov 0   ;;  %s614_s13 = smov 0   ;;  %s693_s0 = inlined_call_operand.vmem [shape: f32[2,48,4], index: 0, kind: input, shape index: {}]   ;;  %s694_s1 = inlined_call_operand.vmem [shape: bf16[4,32], index: 1, kind: input, shape index: {}]   ;;  %s695_s2 = inlined_call_operand.vmem [shape: f32[1,32], index: 2, kind: input, shape index: {}]   ;;  %s696_s3 = inlined_call_operand.hbm [shape: f32[2,32], index: 3, kind: output, shape index: {}]  }
   0x1   :  { %s616_s14 = smov 0   ;;  %s618_s15 = smov 0  }
   0x2   :  { %s620_s16 = smov 0  }
   0x3 LB: > { %s421_s17 = sadd.s32 4294967295, %s588_s16   ;;  %s23_s18 = sadd.s32 1, %s584_s15  ;;  %s588_s16 = sphi %s620_s16, %s14_s16   ;;  %s584_s15 = sphi %s618_s15, %s700_s15   ;;  %s580_s14 = sphi %s616_s14, %s699_s14   ;;  %s576_s13 = sphi %s614_s13, %s698_s13   ;;  %s572_s12 = sphi %s612_s12, %s697_s12  }
   0x4   : > { %p24_p0 = scmp.ge.s32.totalorder %s23_s18, 3  ;;  %p42_p1 = scmp.ne.s32.totalorder %s576_s13, %s572_s12 }
   0x5   : > { %p43_p2 = scmp.eq.s32.totalorder %s588_s16, 0  ;;  %s35_s20 = sadd.s32 1, %s576_s13 }
   0x6   : > { %s702_s18 = smov (%p24_p0, %s23_s18), 0  ;;  %p423_p5 = scmp.ge.s32.totalorder %s588_s16, 3 }
   0x7   : > { %p44_p3 = por %p43_p2, %p42_p1  ;;  %s31_s19 = ssub.s32 %s584_s15, %s702_s18 }
   0x8   : > { %p33_p4 = scmp.eq.s32.totalorder %s31_s19, 0  ;;  %142 = sbr.rel (%p423_p5) target bundleno = 21 (0x15), region = 24 }
   0xa   : > { %s648_s21 = scalar_select %p33_p4, %s576_s13, %s35_s20  }
   0xd   : > { %145 = sbr.rel (!%p44_p3) target bundleno = 21 (0x15), region = 28  ;;  %s147_s22 = sand.u32 (%p44_p3), 1, %s576_s13  }
   0xe   : > { %s437_s23 = sshll.u32 (%p44_p3), %s584_s15, 4  ;;  %s424_s24 = sshll.u32 (%p44_p3), %s147_s22, 5 }
   0xf   : > { %s155_s27 = scalar_lea.vmem (%p44_p3), %s693_s0, %s437_s23  ;;  %s149_s28 = scalar_lea.vmem (%p44_p3), [#allocation3], %s424_s24 }
  0x10   : > { %v190_v0 = vld [vmem:[%s155_s27] sm:$0xff] (%p44_p3)  ;;  %v192_v1 = vld [vmem:[%s155_s27 + $0x8] sm:$0xff] (%p44_p3)  ;;  %v194_v2 = vld [vmem:[%s155_s27 + $0x30] sm:$0xff] (%p44_p3) }
  0x11   : > { %191 = vst [vmem:[%s149_s28] sm:$0xff] (%p44_p3), %v190_v0  ;;  %v196_v3 = vld [vmem:[%s155_s27 + $0x38] sm:$0xff] (%p44_p3) }
  0x12   : > { %193 = vst [vmem:[%s149_s28 + $0x8] sm:$0xff] %v192_v1 }
  0x13   : > { %195 = vst [vmem:[%s149_s28 + $0x10] sm:$0xff] %v194_v2 }
  0x14   : > { %197 = vst [vmem:[%s149_s28 + $0x18] sm:$0xff] %v196_v3 }
  0x15 PF: > { %p427_p6 = scmp.ge.s32.totalorder %s588_s16, 1  ;;  %p202_p7 = scmp.lt.s32.totalorder %s588_s16, 4 }
  0x17   : > { %p203_p8 = pnand %p427_p6, %p202_p7 }
  0x18   : > { %s209_s29 = sand.u32 (!%p203_p8), 1, %s572_s12   ;;  %p429_p9 = scmp.ne.s32.totalorder (!%p203_p8), %s580_s14, 0 }
  0x19   : > { %206 = sbr.rel (%p203_p8) target bundleno = 407 (0x197), region = 66  ;;  %s428_s30 = sshll.u32 (!%p203_p8), %s209_s29, 5 }
  0x1a   : > { %s211_s4 = scalar_lea.vmem (!%p203_p8), [#allocation3], %s428_s30 }
  0x1e   : > { %233 = sbr.rel (%p429_p9) target bundleno = 37 (0x25), region = 74 }
  0x23   : > { %vm234_vm0 = vcmask 254976   ;;  %v590_v4 = vmov 0.0  }
  0x24   : > { %235 = vst.msk [vmem:[#allocation2] sm:$0x3] %vm234_vm0, %v590_v4 }
  0x25 PF: > { %v242_v5 = vld [vmem:[%s694_s1] sm:$0x3]  ;;  %vm254_vm1 = vcmask 1041408   ;;  %v236_v6 = vld [vmem:[%s211_s4] sm:$0xff]  ;;  %v237_v7 = vld [vmem:[%s211_s4 + $0x8] sm:$0xff]  ;;  %vm247_vm2 = vcmask 31744  }
  0x26   : > { %v256_v8 = vsel %vm254_vm1, %v242_v5, 0  ;;  %v240_v9 = vpack.c.bf16 %v237_v7, %v236_v6  ;;  %v238_v10 = vld [vmem:[%s211_s4 + $0x10] sm:$0xff]  ;;  %v239_v11 = vld [vmem:[%s211_s4 + $0x18] sm:$0xff]  ;;  %vm290_vm3 = vcmask 261120   ;;  %vm311_vm4 = vcmask 1041409   ;;  %p432_p10 = scmp.ne.s32.totalorder %s580_s14, 2 }
  0x27   : > { %265 = vmatpush.bf16.msra.mxu0 %v256_v8  ;;  %438 = vmatpush.bf16.msra.mxu1 %v256_v8  ;;  %v241_v12 = vpack.c.bf16 %v239_v11, %v238_v10  ;;  %v511_v13 = vld [vmem:[%s695_s2] ss:$0 sm:$0xff]  ;;  %vm315_vm5 = vcmask 254976  }
  0x2a   : > { %430 = vmatmul.msk.bf16.vlgmr.msra.gmra.mxu0 %vm247_vm2, %v240_v9  ;;  %431 = vmatmul.msk.bf16.vlgmr.msra.gmra.mxu1 %vm247_vm2, %v241_v12 }
  0x2b   : > { %v289_v51 = vld [vmem:[#allocation2] sm:$0x3] }
  0xa7   : > { %v267_v14 = vpop.f32.mrf.mxu0  ;;  %v272_v15 = vpop.f32.mrf.mxu1 }
  0xa8   : > { %v268_v16 = vadd.f32 %v511_v13, %v267_v14  ;;  %v273_v17 = vadd.f32 %v511_v13, %v272_v15 }
  0xaa   : > { %v277_v18 = vmax.f32 %v268_v16, 1e-06  ;;  %v279_v19 = vmax.f32 %v273_v17, 1e-06 }
  0xac   : > { %v281_v22 = vmul.f32 %v277_v18, %v277_v18  ;;  %v283_v23 = vmul.f32 %v279_v19, %v279_v19 }
  0xae   : > { %v285_v28 = vmul.f32 %v281_v22, %v277_v18  ;;  %v287_v29 = vmul.f32 %v283_v23, %v279_v19 }
  0xaf   : > { %v269_v20 = vpop.f32.mrf.mxu0  ;;  %v274_v21 = vpop.f32.mrf.mxu1 }
  0xb0   : > { %v270_v24 = vadd.f32 %v511_v13, %v269_v20  ;;  %v275_v25 = vadd.f32 %v511_v13, %v274_v21  ;;  %v291_v34 = vsel %vm290_vm3, %v285_v28, 0.0  ;;  %v300_v35 = vsel %vm290_vm3, %v287_v29, 0.0 }
  0xb2   : > { %v278_v26 = vmax.f32 %v270_v24, 1e-06  ;;  %v280_v27 = vmax.f32 %v275_v25, 1e-06 }
  0xb4   : > { %v282_v30 = vmul.f32 %v278_v26, %v278_v26  ;;  %v284_v31 = vmul.f32 %v280_v27, %v280_v27 }
  0xb6   : > { %v286_v32 = vmul.f32 %v282_v30, %v278_v26  ;;  %v288_v33 = vmul.f32 %v284_v31, %v280_v27 }
  0xb8   : > { %v292_v36 = vsel %vm290_vm3, %v286_v32, 0.0  ;;  %v301_v37 = vsel %vm290_vm3, %v288_v33, 0.0 }
  0xb9   : > { %v293_v38 = vadd.f32 %v292_v36, %v291_v34  ;;  %v302_v39 = vadd.f32 %v301_v37, %v300_v35 }
  0xbb   : > { %v294_v40 = vrot.slane %v293_v38, 4  ;;  %v303_v41 = vrot.slane %v302_v39, 4 }
  0xbd   : > { %v295_v42 = vadd.f32 %v294_v40, %v293_v38  ;;  %v304_v43 = vadd.f32 %v303_v41, %v302_v39 }
  0xbf   : > { %v296_v44 = vrot.slane %v295_v42, 2  ;;  %v305_v45 = vrot.slane %v304_v43, 2 }
  0xc1   : > { %v297_v46 = vadd.f32 %v296_v44, %v295_v42  ;;  %v306_v47 = vadd.f32 %v305_v45, %v304_v43 }
  0xc3   : > { %v298_v48 = vrot.slane %v297_v46, 1  ;;  %v307_v49 = vrot.slane %v306_v47, 1 }
  0xc5   : > { %v299_v50 = vadd.f32 %v298_v48, %v297_v46  ;;  %v308_v52 = vadd.f32 %v307_v49, %v306_v47 }
  0xc6   : > { %320 = sbr.rel (%p432_p10) target bundleno = 401 (0x191), region = 78 }
  0xc7   : > { %v312_v53 = vsel %vm311_vm4, %v308_v52, %v299_v50 }
  0xc8   : > { %v314_v54 = vadd.f32 %v312_v53, %v289_v51 }
  0xca   : > { %316 = vst.msk [vmem:[#allocation2] sm:$0x3] %vm315_vm5, %v314_v54 }
  0xcb   : > { %v322_v55 = vld [vmem:[%s695_s2] sm:$0x1] }
  0xcc   : > { %v323_v56 = vmax.f32 %v322_v55, 1e-06 }
  0xce   : > { %v324_v57 = vmul.f32 %v323_v56, %v323_v56 }
  0xd0   : > { %v325_v58 = vmul.f32 %v324_v57, %v323_v56 }
  0xd1   : > { %v321_v60 = vld [vmem:[#allocation2] sm:$0x3] }
  0xd2   : > { %v326_v59 = vmul.f32 8.0, %v325_v58 }
  0xd4   : > { %v328_v61 = vperm.slane %v326_v59, 0 }
  0xd6   : > { %v330_v62 = vsub.f32 %v321_v60, %v328_v61 }
  0xd8   : > { %v331_v63 = vmax.f32 %v330_v62, 1e-18 }
  0xda   : > { %v332_v0 = vmul.f32 0.025, %v331_v63 }
  0xdc   : > { %v441_v1 = vand.u32 2147483647, %v332_v0  ;;  %v458_v12 = vand.u32 2147483648, %v332_v0  ;;  %vm440_vm8 = vcmp.lt.f32.partialorder %v332_v0, 0.0  ;;  %vm439_vm9 = vcmp.eq.f32.partialorder %v332_v0, 0.0 }
  0xde   : > { %512 = vlog2.f32 %v441_v1  ;;  %vm455_vm6 = vweird.f32 %v441_v1  ;;  %vm457_vm7 = vcmp.eq.f32.partialorder %v441_v1, 0.0  ;;  %vm442_vm10 = vcmp.eq.f32.partialorder %v441_v1, inf }
  0xe4   : > { %v513_v2 = vpop.eup %512 }
  0xe5   : > { %v445_v3 = vmul.f32 -0.33333334, %v513_v2 }
  0xe7   : > { %514 = vpow2.f32 %v445_v3 }
  0xed   : > { %v515_v4 = vpop.eup %514 }
  0xee   : > { %v447_v5 = vmul.f32 %v515_v4, %v515_v4 }
  0xf0   : > { %v448_v6 = vmul.f32 %v447_v5, %v441_v1 }
  0xf2   : > { %v449_v7 = vmul.f32 %v448_v6, %v447_v5 }
  0xf4   : > { %v450_v8 = vsub.f32 %v449_v7, %v515_v4 }
  0xf6   : > { %v451_v9 = vmul.f32 -0.33333334, %v450_v8 }
  0xf8   : > { %v452_v10 = vadd.f32 %v515_v4, %v451_v9 }
  0xfa   : > { %v453_v11 = vmul.f32 %v452_v10, %v332_v0 }
  0xfc   : > { %v454_v13 = vmul.f32 %v453_v11, %v452_v10 }
  0xfe   : > { %v456_v14 = vsel %vm455_vm6, %v332_v0, %v454_v13 }
  0xff   : > { %v459_v15 = vsel %vm457_vm7, %v458_v12, %v456_v14 }
 0x100   : > { %v460_v16 = vsel %vm440_vm8, nan, %v459_v15 }
 0x101   : > { %v461_v17 = vsel %vm439_vm9, 0.0, %v460_v16 }
 0x102   : > { %v462_v18 = vsel %vm442_vm10, inf, %v461_v17 }
 0x103   : > { %v334_v19 = vmul.f32 %v462_v18, %v462_v18 }
 0x105   : > { %v335_v20 = vsel %vm315_vm5, %v334_v19, 0.0 }
 0x106   : > { %336 = vadd.xlane.f32.xlu0 %v335_v20 }
 0x179   : > { %v337_v21 = vpop.xlane.xlu0 %336 }
 0x17a   : > { %v338_v22 = vmax.f32 %v337_v21, 1e-24 }
 0x17c   : > { %516 = vrsqrt.f32 %v338_v22  ;;  %vm345_vm12 = vweird.f32 %v338_v22 }
 0x182   : > { %v517_v23 = vpop.eup %516 }
 0x183   : > { %v340_v24 = vmul.f32 %v517_v23, %v338_v22  ;;  %vm346_vm11 = vweird.f32 %v517_v23 }
 0x184   : > { %vm347_vm13 = vmor %vm345_vm12, %vm346_vm11 }
 0x185   : > { %v341_v25 = vmul.f32 %v517_v23, %v340_v24 }
 0x187   : > { %v342_v26 = vmul.f32 0.5, %v341_v25 }
 0x189   : > { %v343_v27 = vsub.f32 1.5, %v342_v26 }
 0x18b   : > { %v344_v28 = vmul.f32 %v517_v23, %v343_v27 }
 0x18d   : > { %v348_v29 = vsel %vm347_vm13, %v517_v23, %v344_v28 }
 0x18e   : > { %v349_v30 = vmul.f32 %v462_v18, %v348_v29 }
 0x190   : > { %350 = vst.msk [vmem:[#allocation4] sm:$0x3] %vm315_vm5, %v349_v30 }
 0x191 PF: > { %p467_p11 = scmp.eq.s32.totalorder %s421_s17, 2  ;;  %s361_s14 = sshll.u32 %s696_s3, 4  ;;  %s362_s14 = int_to_ptr.hbm [resolvable:$true] %s361_s14 }
 0x192   : > { %s591_s19 = smov [#allocation4]  }
 0x193   : > { %s359_s20 = sshll.u32 %s591_s19, 4  ;;  %s360_s20 = int_to_ptr.vmem [resolvable:$true] %s359_s20 }
 0x194   : > { %464 = dma.vmem_to_hbm [thread:$0]  (%p467_p11), %s360_s20, 32, %s362_s14, [#allocation5]  }
 0x195   : > { %567 = dma.done.wait (%p467_p11), [#allocation5], 32  }
 0x196   : > { %569 = vsyncadd (%p467_p11), [#allocation5], 4294967264 }
 0x197 PF: > { %s14_s16 = sadd.s32 1, %s588_s16   ;;  %s697_s12 = smov %s576_s13 }
 0x198   : > { %p11_p12 = scmp.ge.s32.totalorder %s14_s16, 5   ;;  %s698_s13 = smov %s648_s21 }
 0x199   : > { %s699_s14 = smov %s584_s15  ;;  %s700_s15 = smov %s702_s18 }
 0x19a   :  { %13 = sbr.rel (!%p11_p12) target bundleno = 3 (0x3), region = 111 }
 0x19f   :  { %375 = vsyncpa [#allocation5], 1 }
 0x1a0   :  { %377 = vsyncpa [#allocation5 + $0x1], 1 }

</bundles_post_ra>
